<compile_context>
chip_gen: v7x
topology: tpu7x:2x2x1
jax: 0.10.0
libtpu: 0.0.40
codegen_flags: <defaults>
</compile_context>

<pallas_src>
import functools

import jax
import jax.numpy as jnp
from jax.experimental import pallas as pl
from jax.experimental.pallas import tpu as pltpu

OUT_C = 256          # out_channels used by AsppPooling inside DeepLabV3+'s ASPP
BN_EPS = 1e-5
# Explicit scoped-VMEM limit: above the v5e (16 MiB) / v6e-v7x (32 MiB) defaults,
# below v7x's 64 MiB physical VMEM.
VMEM_LIMIT_BYTES = 40 * 1024 * 1024


def _fold_bn(gamma, beta, mean, var, eps=BN_EPS):
    scale = gamma / jnp.sqrt(var + eps)
    bias = beta - mean * scale
    return scale, bias


# ---------------------------------------------------------------------------
# Kernel 1: tiled global-sum reduction over H*W (pure VPU inner loop)
# ---------------------------------------------------------------------------
def _gap_kernel(x_ref, o_ref, acc_ref, *, hw, hw_tile, n_tiles, tpp):
    p = pl.program_id(1)          # spatial "part" (batch-1 megacore split)
    t = pl.program_id(2)          # spatial tile within the part
    g = p * tpp + t               # global spatial-tile index

    @pl.when(t == 0)
    def _():
        acc_ref[...] = jnp.zeros_like(acc_ref)

    xv = x_ref[0]                 # (Cin, hw_tile), channels on sublanes

    def accum(ncols):             # ncols is static
        n_full = ncols // 128
        for c in range(n_full):   # unrolled, vreg-aligned VPU adds (no XLU)
            acc_ref[...] += xv[:, c * 128:(c + 1) * 128]
        rem = ncols - n_full * 128
        if rem:
            s = n_full * 128
            acc_ref[:, :rem] += xv[:, s:s + rem]

    last_cols = hw - (n_tiles - 1) * hw_tile    # static, in (0, hw_tile]

    if last_cols == hw_tile:
        # HW divides evenly into tiles: every in-range tile is full.
        @pl.when(g < n_tiles)
        def _():
            accum(hw_tile)
    else:
        @pl.when(g < n_tiles - 1)
        def _():
            accum(hw_tile)

        # Last tile: touch only the valid columns (static slice, no mask).
        @pl.when(g == n_tiles - 1)
        def _():
            accum(last_cols)

    @pl.when(t == tpp - 1)
    def _():
        # Single cross-lane reduce, once per (batch, part).
        o_ref[0, 0] = jnp.sum(acc_ref[...], axis=1, keepdims=True)   # (Cin, 1)


# ---------------------------------------------------------------------------
# Kernel 2 (tiny, off the hot loop): combine parts, mean, 1x1 conv + bias + ReLU
# ---------------------------------------------------------------------------
def _conv_bn_relu_kernel(p_ref, w_ref, b_ref, o_ref, *, inv_hw):
    pooled = jnp.sum(p_ref[0], axis=0) * inv_hw                     # (Cin, 1)
    feat = jnp.dot(w_ref[...], pooled,
                   preferred_element_type=jnp.float32)              # (Cout, 1)
    o_ref[0] = jnp.maximum(feat + b_ref[...], 0.0)


# ---------------------------------------------------------------------------
# Kernel 3: broadcast the (Cout, 1) feature to (Cout, HW) lane-dense slabs
# (== bilinear upsample of a 1x1 map with align_corners=True)
# ---------------------------------------------------------------------------
def _broadcast_kernel(f_ref, o_ref):
    o_ref[0] = jnp.broadcast_to(f_ref[0], o_ref.shape[1:])


# ---------------------------------------------------------------------------
# Tile selection helpers (static, shape-based)
# ---------------------------------------------------------------------------
def _pick_hw_tile(hw, cin, budget_bytes=8 << 20):
    """Largest 128-multiple spatial tile keeping one x buffer <= budget."""
    max_cols = max(128, ((budget_bytes // max(cin * 4, 1)) // 128) * 128)
    return hw if hw <= max_cols else max_cols


def _pick_bcast_tile(hw, out_c, budget_bytes=8 << 20):
    """128-multiple output slab; partial trailing block handled by cdiv grid."""
    max_cols = max(128, ((budget_bytes // max(out_c * 4, 1)) // 128) * 128)
    return hw if hw <= max_cols else max_cols


# ---------------------------------------------------------------------------
# Wrapper
# ---------------------------------------------------------------------------
@functools.partial(jax.jit, static_argnames=("hw_tile", "bcast_tile"))
def aspp_pooling_forward(x_nchw, w_oihw, gamma, beta, mean, var,
                         hw_tile=None, bcast_tile=None):
    n, cin, h, w_sp = x_nchw.shape
    out_c = w_oihw.shape[0]
    hw = h * w_sp

    x_flat = x_nchw.reshape(n, cin, hw)          # free: NCHW is contiguous
    wt = w_oihw.reshape(out_c, cin)              # (Cout, Cin) from OIHW 1x1
    scale, bias = _fold_bn(gamma, beta, mean, var)
    wt_folded = wt * scale[:, None]              # fold BN scale into the weight
    bias_col = bias[:, None]                     # (Cout, 1)

    # ---- kernel 1: global sum (per batch, per part) -----------------------
    if hw_tile is None:
        hw_tile = _pick_hw_tile(hw, cin)
    if hw_tile != hw and hw_tile % 128 != 0:
        raise ValueError("hw_tile must be a multiple of 128 or equal H*W")
    n_tiles = pl.cdiv(hw, hw_tile)

    # Batch-1: split the spatial reduction across a second parallel grid axis
    # so both v7x TensorCores share the HBM read; a no-op elsewhere.
    parts = 2 if (n == 1 and n_tiles >= 2) else 1
    tpp = pl.cdiv(n_tiles, parts)

    if parts * tpp == n_tiles:
        x_index = lambda b, p, t: (b, 0, p * tpp + t)
    else:  # ragged split: clamp; the kernel skips out-of-range tiles
        x_index = lambda b, p, t: (b, 0, jnp.minimum(p * tpp + t, n_tiles - 1))

    kernel1 = functools.partial(_gap_kernel, hw=hw, hw_tile=hw_tile,
                                n_tiles=n_tiles, tpp=tpp)
    partial_sums = pl.pallas_call(
        kernel1,
        out_shape=jax.ShapeDtypeStruct((n, parts, cin, 1), jnp.float32),
        grid_spec=pltpu.PrefetchScalarGridSpec(
            num_scalar_prefetch=0,
            grid=(n, parts, tpp),
            in_specs=[pl.BlockSpec((1, cin, hw_tile), x_index)],
            out_specs=pl.BlockSpec((1, 1, cin, 1), lambda b, p, t: (b, p, 0, 0)),
            scratch_shapes=[pltpu.VMEM((cin, 128), jnp.float32)],
        ),
        compiler_params=pltpu.CompilerParams(
            dimension_semantics=("parallel", "parallel", "arbitrary"),
            vmem_limit_bytes=VMEM_LIMIT_BYTES),
    )(x_flat)

    # ---- kernel 2: combine parts + mean + 1x1 conv + BN bias + ReLU -------
    feat = pl.pallas_call(
        functools.partial(_conv_bn_relu_kernel, inv_hw=1.0 / hw),
        out_shape=jax.ShapeDtypeStruct((n, out_c, 1), jnp.float32),
        grid_spec=pltpu.PrefetchScalarGridSpec(
            num_scalar_prefetch=0,
            grid=(n,),
            in_specs=[
                pl.BlockSpec((1, parts, cin, 1), lambda b: (b, 0, 0, 0)),
                pl.BlockSpec((out_c, cin), lambda b: (0, 0)),
                pl.BlockSpec((out_c, 1), lambda b: (0, 0)),
            ],
            out_specs=pl.BlockSpec((1, out_c, 1), lambda b: (b, 0, 0)),
        ),
        compiler_params=pltpu.CompilerParams(
            dimension_semantics=("parallel",)),
    )(partial_sums, wt_folded, bias_col)

    # ---- kernel 3: lane-dense broadcast into the NCHW output --------------
    if bcast_tile is None:
        bcast_tile = _pick_bcast_tile(hw, out_c)
    if bcast_tile != hw and bcast_tile % 128 != 0:
        raise ValueError("bcast_tile must be a multiple of 128 or equal H*W")
    n_btiles = pl.cdiv(hw, bcast_tile)

    out_flat = pl.pallas_call(
        _broadcast_kernel,
        out_shape=jax.ShapeDtypeStruct((n, out_c, hw), jnp.float32),
        grid_spec=pltpu.PrefetchScalarGridSpec(
            num_scalar_prefetch=0,
            grid=(n, n_btiles),
            in_specs=[pl.BlockSpec((1, out_c, 1), lambda b, t: (b, 0, 0))],
            out_specs=pl.BlockSpec((1, out_c, bcast_tile),
                                   lambda b, t: (b, 0, t)),
        ),
        compiler_params=pltpu.CompilerParams(
            dimension_semantics=("parallel", "parallel"),
            vmem_limit_bytes=VMEM_LIMIT_BYTES),
    )(feat)

    return out_flat.reshape(n, out_c, h, w_sp)


# ---------------------------------------------------------------------------
# Pure-JAX reference for a sanity check
# ---------------------------------------------------------------------------
def aspp_pooling_reference(x_nchw, w_oihw, gamma, beta, mean, var):
    n, cin, h, w_sp = x_nchw.shape
    out_c = w_oihw.shape[0]
    pooled = jnp.mean(x_nchw, axis=(2, 3))                      # (N, Cin)
    conv = pooled @ w_oihw.reshape(out_c, cin).T                # (N, Cout)
    scale, bias = _fold_bn(gamma, beta, mean, var)
    feat = jnp.maximum(conv * scale + bias, 0.0)                # (N, Cout)
    # bilinear upsample of a 1x1 map with align_corners=True == broadcast
    return jnp.broadcast_to(feat[:, :, None, None], (n, out_c, h, w_sp))


if __name__ == "__main__":
    key = jax.random.PRNGKey(0)
    kx, kw, kg, kb, km, kv, kx2 = jax.random.split(key, 7)

    N, C_IN, H, W = 2, 4, 16, 16

    x = jax.random.normal(kx, (N, C_IN, H, W), jnp.float32)                 # NCHW
    weight = 0.1 * jax.random.normal(kw, (OUT_C, C_IN, 1, 1), jnp.float32)  # OIHW
    gamma = 1.0 + 0.1 * jax.random.normal(kg, (OUT_C,), jnp.float32)
    beta = 0.1 * jax.random.normal(kb, (OUT_C,), jnp.float32)
    mean = 0.1 * jax.random.normal(km, (OUT_C,), jnp.float32)
    var = jnp.abs(jax.random.normal(kv, (OUT_C,), jnp.float32)) + 0.5

    # Test 1: default (auto) tiles.
    out = jax.block_until_ready(
        aspp_pooling_forward(x, weight, gamma, beta, mean, var))
    assert out.shape == (N, OUT_C, H, W), out.shape
    ref = jax.block_until_ready(
        aspp_pooling_reference(x, weight, gamma, beta, mean, var))
    err = float(jnp.max(jnp.abs(out - ref)))
    assert err < 1e-3, f"mismatch vs reference: {err}"

    # Test 2: explicit small tiles -> multi-step HW reduction (accumulator +
    # pl.when finalize) and the tiled broadcast path.
    out_tiled = jax.block_until_ready(
        aspp_pooling_forward(x, weight, gamma, beta, mean, var,
                             hw_tile=128, bcast_tile=128))
    err_tiled = float(jnp.max(jnp.abs(out_tiled - ref)))
    assert err_tiled < 1e-3, f"tiled mismatch vs reference: {err_tiled}"

    # Test 3: batch=1 with a non-128-multiple HW (19*19=361) -> exercises the
    # two-part megacore split (odd tile count: clamped index + pl.when skip),
    # the static partial-column tail accumulation, and the partial trailing
    # broadcast block.
    x1 = jax.random.normal(kx2, (1, C_IN, 19, 19), jnp.float32)
    out1 = jax.block_until_ready(
        aspp_pooling_forward(x1, weight, gamma, beta, mean, var,
                             hw_tile=128, bcast_tile=128))
    ref1 = jax.block_until_ready(
        aspp_pooling_reference(x1, weight, gamma, beta, mean, var))
    err1 = float(jnp.max(jnp.abs(out1 - ref1)))
    assert err1 < 1e-3, f"batch-1 mismatch vs reference: {err1}"

    print("KERNEL_OK")
</pallas_src>

<mosaic_0001>
module attributes {stable_mosaic.version = 11 : i64} {
  func.func @_gap_kernel(%arg0: i32, %arg1: i32, %arg2: i32, %arg3: memref<1x4x256xf32, #tpu.memory_space<vmem>>, %arg4: memref<1x1x4x1xf32, #tpu.memory_space<vmem>>, %arg5: memref<4x128xf32, #tpu.memory_space<vmem>>) attributes {dimension_semantics = [#tpu.dimension_semantics<parallel>, #tpu.dimension_semantics<parallel>, #tpu.dimension_semantics<arbitrary>], iteration_bounds = array<i64: 2, 1, 1>, scalar_prefetch = 0 : i64, scratch_operands = 1 : i64, tpu.core_type = #tpu.core_type<tc>, window_params = [{transform_indices = @transform_0, window_bounds = array<i64: 1, 4, 256>}, {transform_indices = @transform_1, window_bounds = array<i64: 1, 1, 4, 1>}]} {
    %c1_i32 = arith.constant 1 : i32
    %0 = arith.muli %arg1, %c1_i32 : i32
    %1 = arith.addi %0, %arg2 : i32
    %c0_i32 = arith.constant 0 : i32
    %2 = arith.cmpi eq, %arg2, %c0_i32 : i32
    %3 = arith.extui %2 : i1 to i32
    %c0_i32_0 = arith.constant 0 : i32
    %4 = arith.cmpi ne, %3, %c0_i32_0 : i32
    scf.if %4 {
      %cst = arith.constant 0.000000e+00 : f32
      %13 = vector.broadcast %cst : f32 to vector<4x128xf32>
      %c0_7 = arith.constant 0 : index
      %c0_8 = arith.constant 0 : index
      %14 = vector.load %arg5[%c0_7, %c0_8] : memref<4x128xf32, #tpu.memory_space<vmem>>, vector<4x128xf32>
      tpu.vector_store %arg5[%c0_7, %c0_8], %13 {strides = array<i32>} : memref<4x128xf32, #tpu.memory_space<vmem>>, vector<4x128xf32>,
    } else {
    }
    %c0 = arith.constant 0 : index
    %c0_1 = arith.constant 0 : index
    %c0_2 = arith.constant 0 : index
    %5 = vector.load %arg3[%c0, %c0_1, %c0_2] : memref<1x4x256xf32, #tpu.memory_space<vmem>>, vector<1x4x256xf32>
    %6 = vector.shape_cast %5 : vector<1x4x256xf32> to vector<4x256xf32>
    %c1_i32_3 = arith.constant 1 : i32
    %7 = arith.cmpi slt, %1, %c1_i32_3 : i32
    %8 = arith.extui %7 : i1 to i32
    %c0_i32_4 = arith.constant 0 : i32
    %9 = arith.cmpi ne, %8, %c0_i32_4 : i32
    scf.if %9 {
      %c0_7 = arith.constant 0 : index
      %c0_8 = arith.constant 0 : index
      %13 = vector.load %arg5[%c0_7, %c0_8] : memref<4x128xf32, #tpu.memory_space<vmem>>, vector<4x128xf32>
      %14 = vector.extract_strided_slice %6 {offsets = [0, 0], sizes = [4, 128], strides = [1, 1]} : vector<4x256xf32> to vector<4x128xf32>
      %15 = arith.addf %13, %14 : vector<4x128xf32>
      %c0_9 = arith.constant 0 : index
      %c0_10 = arith.constant 0 : index
      %16 = vector.load %arg5[%c0_9, %c0_10] : memref<4x128xf32, #tpu.memory_space<vmem>>, vector<4x128xf32>
      tpu.vector_store %arg5[%c0_9, %c0_10], %15 {strides = array<i32>} : memref<4x128xf32, #tpu.memory_space<vmem>>, vector<4x128xf32>,
      %c0_11 = arith.constant 0 : index
      %c0_12 = arith.constant 0 : index
      %17 = vector.load %arg5[%c0_11, %c0_12] : memref<4x128xf32, #tpu.memory_space<vmem>>, vector<4x128xf32>
      %18 = vector.extract_strided_slice %6 {offsets = [0, 128], sizes = [4, 128], strides = [1, 1]} : vector<4x256xf32> to vector<4x128xf32>
      %19 = arith.addf %17, %18 : vector<4x128xf32>
      %c0_13 = arith.constant 0 : index
      %c0_14 = arith.constant 0 : index
      %20 = vector.load %arg5[%c0_13, %c0_14] : memref<4x128xf32, #tpu.memory_space<vmem>>, vector<4x128xf32>
      tpu.vector_store %arg5[%c0_13, %c0_14], %19 {strides = array<i32>} : memref<4x128xf32, #tpu.memory_space<vmem>>, vector<4x128xf32>,
    } else {
    }
    %c0_i32_5 = arith.constant 0 : i32
    %10 = arith.cmpi eq, %arg2, %c0_i32_5 : i32
    %11 = arith.extui %10 : i1 to i32
    %c0_i32_6 = arith.constant 0 : i32
    %12 = arith.cmpi ne, %11, %c0_i32_6 : i32
    scf.if %12 {
      %c0_7 = arith.constant 0 : index
      %c0_8 = arith.constant 0 : index
      %13 = vector.load %arg5[%c0_7, %c0_8] : memref<4x128xf32, #tpu.memory_space<vmem>>, vector<4x128xf32>
      %cst = arith.constant dense<0.000000e+00> : vector<4xf32>
      %14 = vector.multi_reduction <add>, %13, %cst [1] : vector<4x128xf32> to vector<4xf32>
      %15 = vector.shape_cast %14 : vector<4xf32> to vector<4x1xf32>
      %c0_9 = arith.constant 0 : index
      %c0_10 = arith.constant 0 : index
      %c0_11 = arith.constant 0 : index
      %c0_12 = arith.constant 0 : index
      %16 = vector.load %arg4[%c0_9, %c0_10, %c0_11, %c0_12] : memref<1x1x4x1xf32, #tpu.memory_space<vmem>>, vector<1x1x4x1xf32>
      %17 = vector.shape_cast %16 : vector<1x1x4x1xf32> to vector<4x1xf32>
      %18 = vector.shape_cast %15 : vector<4x1xf32> to vector<1x1x4x1xf32>
      tpu.vector_store %arg4[%c0_9, %c0_10, %c0_11, %c0_12], %18 {strides = array<i32>} : memref<1x1x4x1xf32, #tpu.memory_space<vmem>>, vector<1x1x4x1xf32>,
    } else {
    }
    return
  }
  func.func @transform_0(%arg0: i32, %arg1: i32, %arg2: i32) -> (i32, i32, i32) {
    %c1_i32 = arith.constant 1 : i32
    %0 = arith.muli %arg1, %c1_i32 : i32
    %1 = arith.addi %0, %arg2 : i32
    %c0_i32 = arith.constant 0 : i32
    %c0_i32_0 = arith.constant 0 : i32
    return %arg0, %c0_i32, %1 : i32, i32, i32
  }
  func.func @transform_1(%arg0: i32, %arg1: i32, %arg2: i32) -> (i32, i32, i32, i32) {
    %c0_i32 = arith.constant 0 : i32
    %c0_i32_0 = arith.constant 0 : i32
    %c0_i32_1 = arith.constant 0 : i32
    return %arg0, %arg1, %c0_i32, %c0_i32_0 : i32, i32, i32, i32
  }
}

module attributes {stable_mosaic.version = 11 : i64} {
  func.func @_conv_bn_relu_kernel(%arg0: i32, %arg1: memref<1x1x4x1xf32, #tpu.memory_space<vmem>>, %arg2: memref<256x4xf32, #tpu.memory_space<vmem>>, %arg3: memref<256x1xf32, #tpu.memory_space<vmem>>, %arg4: memref<1x256x1xf32, #tpu.memory_space<vmem>>) attributes {dimension_semantics = [#tpu.dimension_semantics<parallel>], iteration_bounds = array<i64: 2>, scalar_prefetch = 0 : i64, scratch_operands = 0 : i64, tpu.core_type = #tpu.core_type<tc>, window_params = [{transform_indices = @transform_0, window_bounds = array<i64: 1, 1, 4, 1>}, {pipeline_mode = #tpu.pipeline_mode<synchronous>, transform_indices = @transform_1, window_bounds = array<i64: 256, 4>}, {pipeline_mode = #tpu.pipeline_mode<synchronous>, transform_indices = @transform_2, window_bounds = array<i64: 256, 1>}, {transform_indices = @transform_3, window_bounds = array<i64: 1, 256, 1>}]} {
    %c0 = arith.constant 0 : index
    %c0_0 = arith.constant 0 : index
    %c0_1 = arith.constant 0 : index
    %c0_2 = arith.constant 0 : index
    %0 = vector.load %arg1[%c0, %c0_0, %c0_1, %c0_2] : memref<1x1x4x1xf32, #tpu.memory_space<vmem>>, vector<1x1x4x1xf32>
    %1 = vector.shape_cast %0 : vector<1x1x4x1xf32> to vector<1x4x1xf32>
    %cst = arith.constant dense<0.000000e+00> : vector<4x1xf32>
    %2 = vector.multi_reduction <add>, %1, %cst [0] : vector<1x4x1xf32> to vector<4x1xf32>
    %cst_3 = arith.constant 3.906250e-03 : f32
    %3 = vector.broadcast %cst_3 : f32 to vector<4x1xf32>
    %4 = arith.mulf %2, %3 : vector<4x1xf32>
    %c0_4 = arith.constant 0 : index
    %c0_5 = arith.constant 0 : index
    %5 = vector.load %arg2[%c0_4, %c0_5] : memref<256x4xf32, #tpu.memory_space<vmem>>, vector<256x4xf32>
    %cst_6 = arith.constant dense<0.000000e+00> : vector<256x1xf32>
    %6 = tpu.matmul %5, %4, %cst_6 {dimension_numbers = #tpu.dot_dimension_numbers<[1], [0], [0], [1], [0, 0, 1, 1], [], []>} : vector<256x4xf32>, vector<4x1xf32>, vector<256x1xf32> -> vector<256x1xf32>
    %c0_7 = arith.constant 0 : index
    %c0_8 = arith.constant 0 : index
    %7 = vector.load %arg3[%c0_7, %c0_8] : memref<256x1xf32, #tpu.memory_space<vmem>>, vector<256x1xf32>
    %8 = arith.addf %6, %7 : vector<256x1xf32>
    %cst_9 = arith.constant 0.000000e+00 : f32
    %9 = vector.broadcast %cst_9 : f32 to vector<256x1xf32>
    %10 = arith.maximumf %8, %9 : vector<256x1xf32>
    %c0_10 = arith.constant 0 : index
    %c0_11 = arith.constant 0 : index
    %c0_12 = arith.constant 0 : index
    %11 = vector.load %arg4[%c0_10, %c0_11, %c0_12] : memref<1x256x1xf32, #tpu.memory_space<vmem>>, vector<1x256x1xf32>
    %12 = vector.shape_cast %11 : vector<1x256x1xf32> to vector<256x1xf32>
    %13 = vector.shape_cast %10 : vector<256x1xf32> to vector<1x256x1xf32>
    tpu.vector_store %arg4[%c0_10, %c0_11, %c0_12], %13 {strides = array<i32>} : memref<1x256x1xf32, #tpu.memory_space<vmem>>, vector<1x256x1xf32>,
    return
  }
  func.func @transform_0(%arg0: i32) -> (i32, i32, i32, i32) {
    %c0_i32 = arith.constant 0 : i32
    %c0_i32_0 = arith.constant 0 : i32
    %c0_i32_1 = arith.constant 0 : i32
    %c0_i32_2 = arith.constant 0 : i32
    return %arg0, %c0_i32, %c0_i32_0, %c0_i32_1 : i32, i32, i32, i32
  }
  func.func @transform_1(%arg0: i32) -> (i32, i32) {
    %c0_i32 = arith.constant 0 : i32
    %c0_i32_0 = arith.constant 0 : i32
    %c0_i32_1 = arith.constant 0 : i32
    return %c0_i32, %c0_i32_0 : i32, i32
  }
  func.func @transform_2(%arg0: i32) -> (i32, i32) {
    %c0_i32 = arith.constant 0 : i32
    %c0_i32_0 = arith.constant 0 : i32
    %c0_i32_1 = arith.constant 0 : i32
    return %c0_i32, %c0_i32_0 : i32, i32
  }
  func.func @transform_3(%arg0: i32) -> (i32, i32, i32) {
    %c0_i32 = arith.constant 0 : i32
    %c0_i32_0 = arith.constant 0 : i32
    %c0_i32_1 = arith.constant 0 : i32
    return %arg0, %c0_i32, %c0_i32_0 : i32, i32, i32
  }
}

module attributes {stable_mosaic.version = 11 : i64} {
  func.func @_broadcast_kernel(%arg0: i32, %arg1: i32, %arg2: memref<1x256x1xf32, #tpu.memory_space<vmem>>, %arg3: memref<1x256x256xf32, #tpu.memory_space<vmem>>) attributes {dimension_semantics = [#tpu.dimension_semantics<parallel>, #tpu.dimension_semantics<parallel>], iteration_bounds = array<i64: 2, 1>, scalar_prefetch = 0 : i64, scratch_operands = 0 : i64, tpu.core_type = #tpu.core_type<tc>, window_params = [{transform_indices = @transform_0, window_bounds = array<i64: 1, 256, 1>}, {transform_indices = @transform_1, window_bounds = array<i64: 1, 256, 256>}]} {
    %c0 = arith.constant 0 : index
    %c0_0 = arith.constant 0 : index
    %c0_1 = arith.constant 0 : index
    %0 = vector.load %arg2[%c0, %c0_0, %c0_1] : memref<1x256x1xf32, #tpu.memory_space<vmem>>, vector<1x256x1xf32>
    %1 = vector.shape_cast %0 : vector<1x256x1xf32> to vector<256x1xf32>
    %2 = vector.shape_cast %1 : vector<256x1xf32> to vector<256x1xf32>
    %3 = vector.broadcast %2 : vector<256x1xf32> to vector<256x256xf32>
    %c0_2 = arith.constant 0 : index
    %c0_3 = arith.constant 0 : index
    %c0_4 = arith.constant 0 : index
    %4 = vector.load %arg3[%c0_2, %c0_3, %c0_4] : memref<1x256x256xf32, #tpu.memory_space<vmem>>, vector<1x256x256xf32>
    %5 = vector.shape_cast %4 : vector<1x256x256xf32> to vector<256x256xf32>
    %6 = vector.shape_cast %3 : vector<256x256xf32> to vector<1x256x256xf32>
    tpu.vector_store %arg3[%c0_2, %c0_3, %c0_4], %6 {strides = array<i32>} : memref<1x256x256xf32, #tpu.memory_space<vmem>>, vector<1x256x256xf32>,
    return
  }
  func.func @transform_0(%arg0: i32, %arg1: i32) -> (i32, i32, i32) {
    %c0_i32 = arith.constant 0 : i32
    %c0_i32_0 = arith.constant 0 : i32
    %c0_i32_1 = arith.constant 0 : i32
    return %arg0, %c0_i32, %c0_i32_0 : i32, i32, i32
  }
  func.func @transform_1(%arg0: i32, %arg1: i32) -> (i32, i32, i32) {
    %c0_i32 = arith.constant 0 : i32
    %c0_i32_0 = arith.constant 0 : i32
    return %arg0, %c0_i32, %arg1 : i32, i32, i32
  }
}

</mosaic_0001>

<bundles_post_ra>
// kernel: aspp_pooling_forward.3
= control target key start
LH: loop header
LB: loop body
LE: loop exit
PB: predicated region body
PF: predicated region fallthrough
CT: control target
= control target key end

     0   :  { %s347_s6 = smov 0   ;;  %s349_s7 = smov 0   ;;  %s380_s0 = inlined_call_operand.vmem [shape: f32[2,4,256], index: 0, kind: input, shape index: {}]   ;;  %s381_s1 = inlined_call_operand.vmem [shape: f32[2,1,4,1], index: 1, kind: output, shape index: {}]  }
   0x1   :  { %s351_s8 = smov 0  }
   0x2 LB: > { %s30_s9 = sadd.s32 1, %s330_s7  ;;  %p279_p0 = scmp.ge.s32.totalorder %s334_s8, 1  ;;  %s334_s8 = sphi %s351_s8, %s11_s8   ;;  %s330_s7 = sphi %s349_s7, %s383_s7   ;;  %s326_s6 = sphi %s347_s6, %s382_s6  }
   0x3   : > { %p32_p1 = scmp.ge.s32.totalorder %s30_s9, 2  ;;  %p119_p2 = scmp.lt.s32.totalorder %s334_s8, 3 }
   0x5   : > { %s385_s9 = smov (%p32_p1, %s30_s9), 0  ;;  %p120_p3 = pnand %p279_p0, %p119_p2 }
   0x6   : > { %p148_p4 = scmp.lt.s32.totalorder (!%p120_p3), %s326_s6, 1  ;;  %v336_v0 = vmov (!%p120_p3), 0.0   ;;  %vm189_vm0 = vcmask (!%p120_p3), 1043456   ;;  %vm193_vm1 = vcmask (!%p120_p3), 3072  }
   0x7   : > { %123 = sbr.rel (%p120_p3) target bundleno = 182 (0xb6), region = 24  ;;  %170 = vst [vmem:[#allocation2] sm:$0xf] (!%p120_p3), %v336_v0 }
   0xe   : > { %s387_s6 = smov (!%p148_p4, %s326_s6), 1  ;;  %v176_v2 = vld [vmem:[#allocation2] sm:$0xf] }
   0xf   : > { %s285_s10 = sshll.u32 %s387_s6, 3  ;;  %s282_s14 = sshll.u32 %s387_s6, 2 }
  0x10   : > { %s155_s13 = scalar_lea.vmem %s380_s0, %s285_s10  ;;  %s164_s17 = scalar_lea.vmem %s381_s1, %s282_s14 }
  0x11   : > { %v171_v1 = vld [vmem:[%s155_s13] sm:$0xff] }
  0x12   : > { %v177_v3 = vadd.f32 %v176_v2, %v171_v1  ;;  %v181_v4 = vcombine.high %v171_v1, %v171_v1 }
  0x14   : > { %178 = vst [vmem:[#allocation2] sm:$0xf] %v177_v3 }
  0x1b   : > { %v179_v5 = vld [vmem:[#allocation2] sm:$0xf] }
  0x1c   : > { %v183_v6 = vadd.f32 %v181_v4, %v179_v5 }
  0x1e   : > { %184 = vst [vmem:[#allocation2] sm:$0xf] %v183_v6 }
  0x25   : > { %v188_v7 = vld [vmem:[#allocation2] sm:$0xf] }
  0x26   : > { %v190_v8 = vsel %vm189_vm0, %v188_v7, 0.0 }
  0x27   : > { %191 = vadd.xlane.f32.xlu0 %v190_v8 }
  0xb4   : > { %v192_v9 = vpop.xlane.xlu0 %191 }
  0xb5   : > { %194 = vst.msk [vmem:[%s164_s17] sm:$0xf] %vm193_vm1, %v192_v9 }
  0xb6 PF: > { %s11_s8 = sadd.s32 1, %s334_s8   ;;  %s382_s6 = smov %s330_s7 }
  0xb7   : > { %p8_p5 = scmp.ge.s32.totalorder %s11_s8, 4   ;;  %s383_s7 = smov %s385_s9 }
  0xb9   :  { %10 = sbr.rel (!%p8_p5) target bundleno = 2 (0x2), region = 66 }

// kernel: aspp_pooling_forward.5
= control target key start
LH: loop header
LB: loop body
LE: loop exit
PB: predicated region body
PF: predicated region fallthrough
CT: control target
= control target key end

     0   :  { %s552_s6 = smov 0   ;;  %s554_s7 = smov 0   ;;  %s689_s0 = inlined_call_operand.vmem [shape: f32[2,256,1], index: 0, kind: input, shape index: {}]   ;;  %s690_s1 = inlined_call_operand.vmem [shape: f32[2,256,256], index: 1, kind: output, shape index: {}]  }
   0x1   :  { %s556_s8 = smov 0  }
   0x2 LB: > { %s23_s9 = sadd.s32 1, %s535_s7  ;;  %p481_p0 = scmp.ge.s32.totalorder %s539_s8, 1  ;;  %s539_s8 = sphi %s556_s8, %s11_s8   ;;  %s535_s7 = sphi %s554_s7, %s692_s7   ;;  %s531_s6 = sphi %s552_s6, %s691_s6  }
   0x3   : > { %p25_p1 = scmp.ge.s32.totalorder %s23_s9, 2  ;;  %p101_p2 = scmp.lt.s32.totalorder %s539_s8, 3 }
   0x5   : > { %s694_s9 = smov (%p25_p1, %s23_s9), 0  ;;  %p102_p3 = pnand %p481_p0, %p101_p2 }
   0x6   : > { %p125_p4 = scmp.lt.s32.totalorder (!%p102_p3), %s531_s6, 1  ;;  %v541_v0 = vmov (!%p102_p3), 0  }
   0x7   : > { %105 = sbr.rel (%p102_p3) target bundleno = 208 (0xd0), region = 24  ;;  %516 = vset.pattern.permute.xlu1 (!%p102_p3), %v541_v0  ;;  %515 = vset.pattern.permute.xlu0 (!%p102_p3), %v541_v0 }
   0xe   : > { %s696_s6 = smov (!%p125_p4, %s531_s6), 1 }
   0xf   : > { %s488_s10 = sshll.u32 %s696_s6, 8  ;;  %s489_s14 = sshll.u32 %s696_s6, 9 }
  0x10   : > { %s576_s13 = scalar_lea.vmem %s689_s0, %s488_s10  ;;  %s614_s17 = scalar_lea.vmem %s690_s1, %s489_s14 }
  0x11   : > { %v142_v1 = vld [vmem:[%s576_s13 + $0x10] sm:$0xff]  ;;  %v140_v2 = vld [vmem:[%s576_s13] sm:$0xff]  ;;  %v143_v3 = vld [vmem:[%s576_s13 + $0x18] sm:$0xff] }
  0x12   : > { %184 = vperm.xlu1 %516, %v142_v1   ;;  %174 = vperm.xlu0 %515, %v140_v2   ;;  %v141_v4 = vld [vmem:[%s576_s13 + $0x8] sm:$0xff]  ;;  %v144_v6 = vld [vmem:[%s576_s13 + $0x20] sm:$0xff]  ;;  %v147_v7 = vld [vmem:[%s576_s13 + $0x38] sm:$0xff] }
  0x13   : > { %v145_v5 = vld [vmem:[%s576_s13 + $0x28] sm:$0xff]  ;;  %v146_v8 = vld [vmem:[%s576_s13 + $0x30] sm:$0xff]  ;;  %v148_v10 = vld [vmem:[%s576_s13 + $0x40] sm:$0xff] }
  0x14   : > { %v149_v9 = vld [vmem:[%s576_s13 + $0x48] sm:$0xff]  ;;  %v151_v11 = vld [vmem:[%s576_s13 + $0x58] sm:$0xff]  ;;  %v150_v12 = vld [vmem:[%s576_s13 + $0x50] sm:$0xff] }
  0x15   : > { %v153_v13 = vld [vmem:[%s576_s13 + $0x68] sm:$0xff]  ;;  %v152_v14 = vld [vmem:[%s576_s13 + $0x60] sm:$0xff]  ;;  %v155_v15 = vld [vmem:[%s576_s13 + $0x78] sm:$0xff] }
  0x16   : > { %189 = vperm.xlu1 %516, %v143_v3   ;;  %179 = vperm.xlu0 %515, %v141_v4   ;;  %v154_v16 = vld [vmem:[%s576_s13 + $0x70] sm:$0xff]  ;;  %v157_v17 = vld [vmem:[%s576_s13 + $0x88] sm:$0xff]  ;;  %v156_v18 = vld [vmem:[%s576_s13 + $0x80] sm:$0xff] }
  0x17   : > { %v159_v19 = vld [vmem:[%s576_s13 + $0x98] sm:$0xff]  ;;  %v158_v20 = vld [vmem:[%s576_s13 + $0x90] sm:$0xff]  ;;  %v161_v21 = vld [vmem:[%s576_s13 + $0xa8] sm:$0xff] }
  0x18   : > { %v160_v22 = vld [vmem:[%s576_s13 + $0xa0] sm:$0xff]  ;;  %v163_v23 = vld [vmem:[%s576_s13 + $0xb8] sm:$0xff]  ;;  %v162_v24 = vld [vmem:[%s576_s13 + $0xb0] sm:$0xff] }
  0x19   : > { %v165_v25 = vld [vmem:[%s576_s13 + $0xc8] sm:$0xff]  ;;  %v164_v26 = vld [vmem:[%s576_s13 + $0xc0] sm:$0xff]  ;;  %v167_v27 = vld [vmem:[%s576_s13 + $0xd8] sm:$0xff] }
  0x1a   : > { %199 = vperm.xlu1 %516, %v145_v5   ;;  %194 = vperm.xlu0 %515, %v144_v6   ;;  %v166_v28 = vld [vmem:[%s576_s13 + $0xd0] sm:$0xff]  ;;  %v169_v29 = vld [vmem:[%s576_s13 + $0xe8] sm:$0xff]  ;;  %v168_v30 = vld [vmem:[%s576_s13 + $0xe0] sm:$0xff] }
  0x1b   : > { %v171_v31 = vld [vmem:[%s576_s13 + $0xf8] sm:$0xff]  ;;  %v170_v32 = vld [vmem:[%s576_s13 + $0xf0] sm:$0xff] }
  0x1e   : > { %209 = vperm.xlu1 %516, %v147_v7   ;;  %204 = vperm.xlu0 %515, %v146_v8  }
  0x22   : > { %219 = vperm.xlu1 %516, %v149_v9   ;;  %214 = vperm.xlu0 %515, %v148_v10  }
  0x26   : > { %229 = vperm.xlu1 %516, %v151_v11   ;;  %224 = vperm.xlu0 %515, %v150_v12  }
  0x2a   : > { %239 = vperm.xlu1 %516, %v153_v13   ;;  %234 = vperm.xlu0 %515, %v152_v14  }
  0x2e   : > { %249 = vperm.xlu1 %516, %v155_v15   ;;  %244 = vperm.xlu0 %515, %v154_v16  }
  0x32   : > { %259 = vperm.xlu1 %516, %v157_v17   ;;  %254 = vperm.xlu0 %515, %v156_v18  }
  0x36   : > { %269 = vperm.xlu1 %516, %v159_v19   ;;  %264 = vperm.xlu0 %515, %v158_v20  }
  0x3a   : > { %279 = vperm.xlu1 %516, %v161_v21   ;;  %274 = vperm.xlu0 %515, %v160_v22  }
  0x3e   : > { %289 = vperm.xlu1 %516, %v163_v23   ;;  %284 = vperm.xlu0 %515, %v162_v24  }
  0x42   : > { %299 = vperm.xlu1 %516, %v165_v25   ;;  %294 = vperm.xlu0 %515, %v164_v26  }
  0x46   : > { %309 = vperm.xlu1 %516, %v167_v27   ;;  %304 = vperm.xlu0 %515, %v166_v28  }
  0x4a   : > { %319 = vperm.xlu1 %516, %v169_v29   ;;  %314 = vperm.xlu0 %515, %v168_v30  }
  0x4e   : > { %329 = vperm.xlu1 %516, %v171_v31   ;;  %324 = vperm.xlu0 %515, %v170_v32  }
  0x91   : > { %v185_v33 = vpop.permute.xlu1 %184  ;;  %v175_v34 = vpop.permute.xlu0 %174 }
  0x92   : > { %336 = vst [vmem:[%s614_s17 + $0x20] sm:$0xff] %v185_v33  ;;  %337 = vst [vmem:[%s614_s17 + $0x28] sm:$0xff] %v185_v33 }
  0x93   : > { %332 = vst [vmem:[%s614_s17] sm:$0xff] %v175_v34  ;;  %333 = vst [vmem:[%s614_s17 + $0x8] sm:$0xff] %v175_v34 }
  0x95   : > { %v190_v35 = vpop.permute.xlu1 %189  ;;  %v180_v36 = vpop.permute.xlu0 %179 }
  0x96   : > { %338 = vst [vmem:[%s614_s17 + $0x30] sm:$0xff] %v190_v35  ;;  %339 = vst [vmem:[%s614_s17 + $0x38] sm:$0xff] %v190_v35 }
  0x97   : > { %334 = vst [vmem:[%s614_s17 + $0x10] sm:$0xff] %v180_v36  ;;  %335 = vst [vmem:[%s614_s17 + $0x18] sm:$0xff] %v180_v36 }
  0x99   : > { %v200_v37 = vpop.permute.xlu1 %199  ;;  %v195_v38 = vpop.permute.xlu0 %194 }
  0x9a   : > { %342 = vst [vmem:[%s614_s17 + $0x50] sm:$0xff] %v200_v37  ;;  %343 = vst [vmem:[%s614_s17 + $0x58] sm:$0xff] %v200_v37 }
  0x9b   : > { %340 = vst [vmem:[%s614_s17 + $0x40] sm:$0xff] %v195_v38  ;;  %341 = vst [vmem:[%s614_s17 + $0x48] sm:$0xff] %v195_v38 }
  0x9d   : > { %v210_v39 = vpop.permute.xlu1 %209  ;;  %v205_v40 = vpop.permute.xlu0 %204 }
  0x9e   : > { %346 = vst [vmem:[%s614_s17 + $0x70] sm:$0xff] %v210_v39  ;;  %347 = vst [vmem:[%s614_s17 + $0x78] sm:$0xff] %v210_v39 }
  0x9f   : > { %344 = vst [vmem:[%s614_s17 + $0x60] sm:$0xff] %v205_v40  ;;  %345 = vst [vmem:[%s614_s17 + $0x68] sm:$0xff] %v205_v40 }
  0xa1   : > { %v220_v41 = vpop.permute.xlu1 %219  ;;  %v215_v42 = vpop.permute.xlu0 %214 }
  0xa2   : > { %350 = vst [vmem:[%s614_s17 + $0x90] sm:$0xff] %v220_v41  ;;  %351 = vst [vmem:[%s614_s17 + $0x98] sm:$0xff] %v220_v41 }
  0xa3   : > { %348 = vst [vmem:[%s614_s17 + $0x80] sm:$0xff] %v215_v42  ;;  %349 = vst [vmem:[%s614_s17 + $0x88] sm:$0xff] %v215_v42 }
  0xa5   : > { %v230_v43 = vpop.permute.xlu1 %229  ;;  %v225_v44 = vpop.permute.xlu0 %224 }
  0xa6   : > { %354 = vst [vmem:[%s614_s17 + $0xb0] sm:$0xff] %v230_v43  ;;  %355 = vst [vmem:[%s614_s17 + $0xb8] sm:$0xff] %v230_v43 }
  0xa7   : > { %352 = vst [vmem:[%s614_s17 + $0xa0] sm:$0xff] %v225_v44  ;;  %353 = vst [vmem:[%s614_s17 + $0xa8] sm:$0xff] %v225_v44 }
  0xa9   : > { %v240_v45 = vpop.permute.xlu1 %239  ;;  %v235_v46 = vpop.permute.xlu0 %234 }
  0xaa   : > { %358 = vst [vmem:[%s614_s17 + $0xd0] sm:$0xff] %v240_v45  ;;  %359 = vst [vmem:[%s614_s17 + $0xd8] sm:$0xff] %v240_v45 }
  0xab   : > { %356 = vst [vmem:[%s614_s17 + $0xc0] sm:$0xff] %v235_v46  ;;  %357 = vst [vmem:[%s614_s17 + $0xc8] sm:$0xff] %v235_v46 }
  0xad   : > { %v250_v47 = vpop.permute.xlu1 %249  ;;  %v245_v48 = vpop.permute.xlu0 %244 }
  0xae   : > { %362 = vst [vmem:[%s614_s17 + $0xf0] sm:$0xff] %v250_v47  ;;  %363 = vst [vmem:[%s614_s17 + $0xf8] sm:$0xff] %v250_v47 }
  0xaf   : > { %360 = vst [vmem:[%s614_s17 + $0xe0] sm:$0xff] %v245_v48  ;;  %361 = vst [vmem:[%s614_s17 + $0xe8] sm:$0xff] %v245_v48 }
  0xb1   : > { %v260_v49 = vpop.permute.xlu1 %259  ;;  %v255_v50 = vpop.permute.xlu0 %254 }
  0xb2   : > { %366 = vst [vmem:[%s614_s17 + $0x110] sm:$0xff] %v260_v49  ;;  %367 = vst [vmem:[%s614_s17 + $0x118] sm:$0xff] %v260_v49 }
  0xb3   : > { %364 = vst [vmem:[%s614_s17 + $0x100] sm:$0xff] %v255_v50  ;;  %365 = vst [vmem:[%s614_s17 + $0x108] sm:$0xff] %v255_v50 }
  0xb5   : > { %v270_v51 = vpop.permute.xlu1 %269  ;;  %v265_v52 = vpop.permute.xlu0 %264 }
  0xb6   : > { %370 = vst [vmem:[%s614_s17 + $0x130] sm:$0xff] %v270_v51  ;;  %371 = vst [vmem:[%s614_s17 + $0x138] sm:$0xff] %v270_v51 }
  0xb7   : > { %368 = vst [vmem:[%s614_s17 + $0x120] sm:$0xff] %v265_v52  ;;  %369 = vst [vmem:[%s614_s17 + $0x128] sm:$0xff] %v265_v52 }
  0xb9   : > { %v280_v53 = vpop.permute.xlu1 %279  ;;  %v275_v54 = vpop.permute.xlu0 %274 }
  0xba   : > { %374 = vst [vmem:[%s614_s17 + $0x150] sm:$0xff] %v280_v53  ;;  %375 = vst [vmem:[%s614_s17 + $0x158] sm:$0xff] %v280_v53 }
  0xbb   : > { %372 = vst [vmem:[%s614_s17 + $0x140] sm:$0xff] %v275_v54  ;;  %373 = vst [vmem:[%s614_s17 + $0x148] sm:$0xff] %v275_v54 }
  0xbd   : > { %v290_v55 = vpop.permute.xlu1 %289  ;;  %v285_v56 = vpop.permute.xlu0 %284 }
  0xbe   : > { %378 = vst [vmem:[%s614_s17 + $0x170] sm:$0xff] %v290_v55  ;;  %379 = vst [vmem:[%s614_s17 + $0x178] sm:$0xff] %v290_v55 }
  0xbf   : > { %376 = vst [vmem:[%s614_s17 + $0x160] sm:$0xff] %v285_v56  ;;  %377 = vst [vmem:[%s614_s17 + $0x168] sm:$0xff] %v285_v56 }
  0xc1   : > { %v300_v57 = vpop.permute.xlu1 %299  ;;  %v295_v58 = vpop.permute.xlu0 %294 }
  0xc2   : > { %382 = vst [vmem:[%s614_s17 + $0x190] sm:$0xff] %v300_v57  ;;  %383 = vst [vmem:[%s614_s17 + $0x198] sm:$0xff] %v300_v57 }
  0xc3   : > { %380 = vst [vmem:[%s614_s17 + $0x180] sm:$0xff] %v295_v58  ;;  %381 = vst [vmem:[%s614_s17 + $0x188] sm:$0xff] %v295_v58 }
  0xc5   : > { %v310_v59 = vpop.permute.xlu1 %309  ;;  %v305_v60 = vpop.permute.xlu0 %304 }
  0xc6   : > { %386 = vst [vmem:[%s614_s17 + $0x1b0] sm:$0xff] %v310_v59  ;;  %387 = vst [vmem:[%s614_s17 + $0x1b8] sm:$0xff] %v310_v59 }
  0xc7   : > { %384 = vst [vmem:[%s614_s17 + $0x1a0] sm:$0xff] %v305_v60  ;;  %385 = vst [vmem:[%s614_s17 + $0x1a8] sm:$0xff] %v305_v60 }
  0xc9   : > { %v320_v61 = vpop.permute.xlu1 %319  ;;  %v315_v62 = vpop.permute.xlu0 %314 }
  0xca   : > { %390 = vst [vmem:[%s614_s17 + $0x1d0] sm:$0xff] %v320_v61  ;;  %391 = vst [vmem:[%s614_s17 + $0x1d8] sm:$0xff] %v320_v61 }
  0xcb   : > { %388 = vst [vmem:[%s614_s17 + $0x1c0] sm:$0xff] %v315_v62  ;;  %389 = vst [vmem:[%s614_s17 + $0x1c8] sm:$0xff] %v315_v62 }
  0xcd   : > { %v330_v63 = vpop.permute.xlu1 %329  ;;  %v325_v0 = vpop.permute.xlu0 %324 }
  0xce   : > { %394 = vst [vmem:[%s614_s17 + $0x1f0] sm:$0xff] %v330_v63  ;;  %395 = vst [vmem:[%s614_s17 + $0x1f8] sm:$0xff] %v330_v63 }
  0xcf   : > { %392 = vst [vmem:[%s614_s17 + $0x1e0] sm:$0xff] %v325_v0  ;;  %393 = vst [vmem:[%s614_s17 + $0x1e8] sm:$0xff] %v325_v0 }
  0xd0 PF: > { %s11_s8 = sadd.s32 1, %s539_s8   ;;  %s691_s6 = smov %s535_s7 }
  0xd1   : > { %p8_p5 = scmp.ge.s32.totalorder %s11_s8, 4   ;;  %s692_s7 = smov %s694_s9 }
  0xd3   :  { %10 = sbr.rel (!%p8_p5) target bundleno = 2 (0x2), region = 54 }

// kernel: aspp_pooling_forward.4
= control target key start
LH: loop header
LB: loop body
LE: loop exit
PB: predicated region body
PF: predicated region fallthrough
CT: control target
= control target key end

     0   :  { %s846_s12 = smov 0   ;;  %s1157_s0 = inlined_call_operand.vmem [shape: f32[2,1,4,1], index: 0, kind: input, shape index: {}]   ;;  %s1158_s1 = inlined_call_operand.vmem [shape: f32[256,4], index: 1, kind: input, shape index: {}]   ;;  %s1159_s2 = inlined_call_operand.vmem [shape: f32[256,1], index: 2, kind: input, shape index: {}]   ;;  %s1160_s3 = inlined_call_operand.vmem [shape: f32[2,256,1], index: 3, kind: output, shape index: {}]  }
   0x1 LB: > { %s681_s13 = sadd.s32 4294967295, %s824_s12   ;;  %p685_p0 = scmp.ge.s32.totalorder %s824_s12, 1  ;;  %s824_s12 = sphi %s846_s12, %s13_s12  }
   0x2   : > { %p136_p1 = scmp.lt.s32.totalorder %s824_s12, 3 }
   0x4   : > { %p137_p2 = pnand %p685_p0, %p136_p1 }
   0x5   : > { %p159_p3 = scmp.lt.s32.totalorder (!%p137_p2), %s681_s13, 1  ;;  %v171_v0 = vld [vmem:[%s1158_s1] sm:$0xff] (!%p137_p2)  ;;  %vm235_vm0 = vcmask (!%p137_p2), 31744   ;;  %vm332_vm1 = vcmask (!%p137_p2), 1043456   ;;  %v172_v4 = vld [vmem:[%s1158_s1 + $0x8] sm:$0xff] (!%p137_p2)  ;;  %v173_v6 = vld [vmem:[%s1158_s1 + $0x10] sm:$0xff] (!%p137_p2) }
   0x6   : > { %140 = sbr.rel (%p137_p2) target bundleno = 267 (0x10b), region = 32  ;;  %v187_v1 = vld [vmem:[%s1158_s1 + $0x80] sm:$0xff] (!%p137_p2)  ;;  %760 = vmatprep.mubr.msk.f32.mxu0 (!%p137_p2), %vm235_vm0, %v171_v0  ;;  %v188_v5 = vld [vmem:[%s1158_s1 + $0x88] sm:$0xff] (!%p137_p2)  ;;  %v189_v7 = vld [vmem:[%s1158_s1 + $0x90] sm:$0xff] (!%p137_p2)  ;;  %vm593_vm2 = vcmask (!%p137_p2), 7168  }
   0x7   : > { %784 = vmatprep.mubr.msk.f32.mxu1 (!%p137_p2), %vm235_vm0, %v187_v1  ;;  %v174_v8 = vld [vmem:[%s1158_s1 + $0x18] sm:$0xff] (!%p137_p2)  ;;  %v175_v10 = vld [vmem:[%s1158_s1 + $0x20] sm:$0xff] (!%p137_p2)  ;;  %v176_v12 = vld [vmem:[%s1158_s1 + $0x28] sm:$0xff] (!%p137_p2) }
   0x8   : > { %v190_v9 = vld [vmem:[%s1158_s1 + $0x98] sm:$0xff] (!%p137_p2)  ;;  %v191_v11 = vld [vmem:[%s1158_s1 + $0xa0] sm:$0xff] (!%p137_p2)  ;;  %v192_v13 = vld [vmem:[%s1158_s1 + $0xa8] sm:$0xff] (!%p137_p2) }
   0x9   : > { %v177_v14 = vld [vmem:[%s1158_s1 + $0x30] sm:$0xff] (!%p137_p2)  ;;  %v178_v16 = vld [vmem:[%s1158_s1 + $0x38] sm:$0xff] (!%p137_p2)  ;;  %v179_v18 = vld [vmem:[%s1158_s1 + $0x40] sm:$0xff] (!%p137_p2) }
   0xa   : > { %v193_v15 = vld [vmem:[%s1158_s1 + $0xb0] sm:$0xff] (!%p137_p2)  ;;  %v194_v17 = vld [vmem:[%s1158_s1 + $0xb8] sm:$0xff] (!%p137_p2)  ;;  %v195_v19 = vld [vmem:[%s1158_s1 + $0xc0] sm:$0xff] (!%p137_p2) }
   0xb   : > { %v180_v20 = vld [vmem:[%s1158_s1 + $0x48] sm:$0xff] (!%p137_p2)  ;;  %v181_v22 = vld [vmem:[%s1158_s1 + $0x50] sm:$0xff] (!%p137_p2)  ;;  %v182_v24 = vld [vmem:[%s1158_s1 + $0x58] sm:$0xff] (!%p137_p2) }
   0xc   : > { %v196_v21 = vld [vmem:[%s1158_s1 + $0xc8] sm:$0xff] (!%p137_p2)  ;;  %v197_v23 = vld [vmem:[%s1158_s1 + $0xd0] sm:$0xff] (!%p137_p2)  ;;  %v198_v25 = vld [vmem:[%s1158_s1 + $0xd8] sm:$0xff] (!%p137_p2) }
   0xd   : > { %s1162_s13 = smov (!%p159_p3, %s681_s13), 1  ;;  %v183_v26 = vld [vmem:[%s1158_s1 + $0x60] sm:$0xff]  ;;  %v184_v28 = vld [vmem:[%s1158_s1 + $0x68] sm:$0xff]  ;;  %v185_v30 = vld [vmem:[%s1158_s1 + $0x70] sm:$0xff] }
   0xe   : > { %s686_s18 = sshll.u32 %s1162_s13, 2  ;;  %v199_v27 = vld [vmem:[%s1158_s1 + $0xe0] sm:$0xff]  ;;  %v200_v29 = vld [vmem:[%s1158_s1 + $0xe8] sm:$0xff]  ;;  %v201_v31 = vld [vmem:[%s1158_s1 + $0xf0] sm:$0xff]  ;;  %s724_s9 = sshll.u32 %s1162_s13, 8 }
   0xf   : > { %s162_s21 = scalar_lea.vmem %s1157_s0, %s686_s18  ;;  %v186_v32 = vld [vmem:[%s1158_s1 + $0x78] sm:$0xff]  ;;  %v204_v34 = vld [vmem:[%s1159_s2 + $0x8] sm:$0xff]  ;;  %v203_v36 = vld [vmem:[%s1159_s2] sm:$0xff]  ;;  %s1004_s18 = scalar_lea.vmem %s1160_s3, %s724_s9 }
  0x10   : > { %v168_v2 = vld [vmem:[%s162_s21] sm:$0xf]  ;;  %v202_v33 = vld [vmem:[%s1158_s1 + $0xf8] sm:$0xff]  ;;  %v220_v35 = vld [vmem:[%s1159_s2 + $0x88] sm:$0xff] }
  0x11   : > { %v170_v3 = vmul.f32 0.00390625, %v168_v2  ;;  %v219_v37 = vld [vmem:[%s1159_s2 + $0x80] sm:$0xff]  ;;  %v206_v46 = vld [vmem:[%s1159_s2 + $0x18] sm:$0xff]  ;;  %v205_v50 = vld [vmem:[%s1159_s2 + $0x10] sm:$0xff] }
  0x12   : > { %v222_v47 = vld [vmem:[%s1159_s2 + $0x98] sm:$0xff]  ;;  %v221_v51 = vld [vmem:[%s1159_s2 + $0x90] sm:$0xff]  ;;  %v208_v62 = vld [vmem:[%s1159_s2 + $0x28] sm:$0xff] }
  0x13   : > { %758 = vmatprep.subr.msk.mxu0 %vm332_vm1, %v170_v3  ;;  %808 = vmatprep.subr.msk.mxu1 %vm332_vm1, %v170_v3  ;;  %v224_v63 = vld [vmem:[%s1159_s2 + $0xa8] sm:$0xff]  ;;  %v207_v2 = vld [vmem:[%s1159_s2 + $0x20] sm:$0xff] }
  0x14   : > { %759 = vmatpush3.msk.msra.mxu0 %vm332_vm1, %v170_v3  ;;  %809 = vmatpush3.msk.msra.mxu1 %vm332_vm1, %v170_v3  ;;  %v223_v3 = vld [vmem:[%s1159_s2 + $0xa0] sm:$0xff] }
  0x15   : > { %761 = vmatmul.mubr.msk.f32.vlgmr.msra.gmra.mrb[0].mxu0 %vm235_vm0, %v172_v4  ;;  %785 = vmatmul.mubr.msk.f32.vlgmr.msra.gmra.mrb[0].mxu1 %vm235_vm0, %v188_v5 }
  0x16   : > { %763 = vmatprep.mubr.msk.f32.mxu0 %vm235_vm0, %v173_v6  ;;  %787 = vmatprep.mubr.msk.f32.mxu1 %vm235_vm0, %v189_v7 }
  0x19   : > { %764 = vmatmul.mubr.msk.f32.gmra.mrb[2].mxu0 %vm235_vm0, %v174_v8  ;;  %788 = vmatmul.mubr.msk.f32.gmra.mrb[2].mxu1 %vm235_vm0, %v190_v9 }
  0x1a   : > { %766 = vmatprep.mubr.msk.f32.mxu0 %vm235_vm0, %v175_v10  ;;  %790 = vmatprep.mubr.msk.f32.mxu1 %vm235_vm0, %v191_v11 }
  0x1d   : > { %767 = vmatmul.mubr.msk.f32.gmra.mrb[4].mxu0 %vm235_vm0, %v176_v12  ;;  %791 = vmatmul.mubr.msk.f32.gmra.mrb[4].mxu1 %vm235_vm0, %v192_v13 }
  0x1e   : > { %769 = vmatprep.mubr.msk.f32.mxu0 %vm235_vm0, %v177_v14  ;;  %793 = vmatprep.mubr.msk.f32.mxu1 %vm235_vm0, %v193_v15  ;;  %v210_v14 = vld [vmem:[%s1159_s2 + $0x38] sm:$0xff] }
  0x1f   : > { %v226_v15 = vld [vmem:[%s1159_s2 + $0xb8] sm:$0xff] }
  0x21   : > { %770 = vmatmul.mubr.msk.f32.gmra.mrb[6].mxu0 %vm235_vm0, %v178_v16  ;;  %794 = vmatmul.mubr.msk.f32.gmra.mrb[6].mxu1 %vm235_vm0, %v194_v17 }
  0x22   : > { %772 = vmatprep.mubr.msk.f32.mxu0 %vm235_vm0, %v179_v18  ;;  %796 = vmatprep.mubr.msk.f32.mxu1 %vm235_vm0, %v195_v19  ;;  %v209_v18 = vld [vmem:[%s1159_s2 + $0x30] sm:$0xff] }
  0x23   : > { %v225_v19 = vld [vmem:[%s1159_s2 + $0xb0] sm:$0xff] }
  0x25   : > { %773 = vmatmul.mubr.msk.f32.gmra.mrb[8].mxu0 %vm235_vm0, %v180_v20  ;;  %797 = vmatmul.mubr.msk.f32.gmra.mrb[8].mxu1 %vm235_vm0, %v196_v21 }
  0x26   : > { %775 = vmatprep.mubr.msk.f32.mxu0 %vm235_vm0, %v181_v22  ;;  %799 = vmatprep.mubr.msk.f32.mxu1 %vm235_vm0, %v197_v23 }
  0x29   : > { %776 = vmatmul.mubr.msk.f32.gmra.mrb[10].mxu0 %vm235_vm0, %v182_v24  ;;  %800 = vmatmul.mubr.msk.f32.gmra.mrb[10].mxu1 %vm235_vm0, %v198_v25 }
  0x2a   : > { %778 = vmatprep.mubr.msk.f32.mxu0 %vm235_vm0, %v183_v26  ;;  %802 = vmatprep.mubr.msk.f32.mxu1 %vm235_vm0, %v199_v27 }
  0x2d   : > { %779 = vmatmul.mubr.msk.f32.gmra.mrb[12].mxu0 %vm235_vm0, %v184_v28  ;;  %803 = vmatmul.mubr.msk.f32.gmra.mrb[12].mxu1 %vm235_vm0, %v200_v29 }
  0x2e   : > { %781 = vmatprep.mubr.msk.f32.mxu0 %vm235_vm0, %v185_v30  ;;  %805 = vmatprep.mubr.msk.f32.mxu1 %vm235_vm0, %v201_v31  ;;  %v212_v30 = vld [vmem:[%s1159_s2 + $0x48] sm:$0xff] }
  0x2f   : > { %v228_v31 = vld [vmem:[%s1159_s2 + $0xc8] sm:$0xff] }
  0x31   : > { %782 = vmatmul.mubr.msk.f32.gmra.mrb[14].mxu0 %vm235_vm0, %v186_v32  ;;  %806 = vmatmul.mubr.msk.f32.gmra.mrb[14].mxu1 %vm235_vm0, %v202_v33 }
  0xe8   : > { %v762_v38 = vpop.f32.mrb[0].mxu0  ;;  %v786_v39 = vpop.f32.mrb[0].mxu1 }
  0xe9   : > { %v408_v40 = vadd.f32 %v762_v38, %v204_v34  ;;  %v488_v41 = vadd.f32 %v786_v39, %v220_v35  ;;  %v402_v42 = vpop.f32.mrb[1].mxu0  ;;  %v482_v43 = vpop.f32.mrb[1].mxu1  ;;  %v211_v34 = vld [vmem:[%s1159_s2 + $0x40] sm:$0xff] }
  0xea   : > { %v403_v44 = vadd.f32 %v402_v42, %v203_v36  ;;  %v483_v45 = vadd.f32 %v482_v43, %v219_v37  ;;  %v227_v35 = vld [vmem:[%s1159_s2 + $0xc0] sm:$0xff] }
  0xeb   : > { %v562_v48 = vmax.f32 %v408_v40, 0.0  ;;  %v578_v49 = vmax.f32 %v488_v41, 0.0 }
  0xec   : > { %v561_v52 = vmax.f32 %v403_v44, 0.0  ;;  %v577_v53 = vmax.f32 %v483_v45, 0.0  ;;  %v765_v54 = vpop.f32.mrb[2].mxu0  ;;  %v789_v55 = vpop.f32.mrb[2].mxu1 }
  0xed   : > { %595 = vst.msk [vmem:[%s1004_s18 + $0x8] sm:$0xff] %vm593_vm2, %v562_v48  ;;  %611 = vst.msk [vmem:[%s1004_s18 + $0x88] sm:$0xff] %vm593_vm2, %v578_v49  ;;  %v418_v56 = vadd.f32 %v765_v54, %v206_v46  ;;  %v498_v57 = vadd.f32 %v789_v55, %v222_v47  ;;  %v412_v58 = vpop.f32.mrb[3].mxu0  ;;  %v492_v59 = vpop.f32.mrb[3].mxu1  ;;  %v214_v46 = vld [vmem:[%s1159_s2 + $0x58] sm:$0xff] }
  0xee   : > { %594 = vst.msk [vmem:[%s1004_s18] sm:$0xff] %vm593_vm2, %v561_v52  ;;  %610 = vst.msk [vmem:[%s1004_s18 + $0x80] sm:$0xff] %vm593_vm2, %v577_v53  ;;  %v413_v60 = vadd.f32 %v412_v58, %v205_v50  ;;  %v493_v61 = vadd.f32 %v492_v59, %v221_v51  ;;  %v230_v47 = vld [vmem:[%s1159_s2 + $0xd8] sm:$0xff]  ;;  %v213_v50 = vld [vmem:[%s1159_s2 + $0x50] sm:$0xff] }
  0xef   : > { %v564_v0 = vmax.f32 %v418_v56, 0.0  ;;  %v580_v1 = vmax.f32 %v498_v57, 0.0  ;;  %v229_v51 = vld [vmem:[%s1159_s2 + $0xd0] sm:$0xff] }
  0xf0   : > { %v563_v4 = vmax.f32 %v413_v60, 0.0  ;;  %v579_v5 = vmax.f32 %v493_v61, 0.0  ;;  %v768_v6 = vpop.f32.mrb[4].mxu0  ;;  %v792_v7 = vpop.f32.mrb[4].mxu1 }
  0xf1   : > { %597 = vst.msk [vmem:[%s1004_s18 + $0x18] sm:$0xff] %vm593_vm2, %v564_v0  ;;  %613 = vst.msk [vmem:[%s1004_s18 + $0x98] sm:$0xff] %vm593_vm2, %v580_v1  ;;  %v428_v8 = vadd.f32 %v768_v6, %v208_v62  ;;  %v508_v9 = vadd.f32 %v792_v7, %v224_v63  ;;  %v422_v10 = vpop.f32.mrb[5].mxu0  ;;  %v502_v11 = vpop.f32.mrb[5].mxu1  ;;  %v216_v62 = vld [vmem:[%s1159_s2 + $0x68] sm:$0xff] }
  0xf2   : > { %596 = vst.msk [vmem:[%s1004_s18 + $0x10] sm:$0xff] %vm593_vm2, %v563_v4  ;;  %612 = vst.msk [vmem:[%s1004_s18 + $0x90] sm:$0xff] %vm593_vm2, %v579_v5  ;;  %v423_v12 = vadd.f32 %v422_v10, %v207_v2  ;;  %v503_v13 = vadd.f32 %v502_v11, %v223_v3  ;;  %v232_v63 = vld [vmem:[%s1159_s2 + $0xe8] sm:$0xff]  ;;  %v215_v2 = vld [vmem:[%s1159_s2 + $0x60] sm:$0xff] }
  0xf3   : > { %v566_v16 = vmax.f32 %v428_v8, 0.0  ;;  %v582_v17 = vmax.f32 %v508_v9, 0.0  ;;  %v231_v3 = vld [vmem:[%s1159_s2 + $0xe0] sm:$0xff] }
  0xf4   : > { %v565_v20 = vmax.f32 %v423_v12, 0.0  ;;  %v581_v21 = vmax.f32 %v503_v13, 0.0  ;;  %v771_v22 = vpop.f32.mrb[6].mxu0  ;;  %v795_v23 = vpop.f32.mrb[6].mxu1 }
  0xf5   : > { %599 = vst.msk [vmem:[%s1004_s18 + $0x28] sm:$0xff] %vm593_vm2, %v566_v16  ;;  %615 = vst.msk [vmem:[%s1004_s18 + $0xa8] sm:$0xff] %vm593_vm2, %v582_v17  ;;  %v438_v24 = vadd.f32 %v771_v22, %v210_v14  ;;  %v518_v25 = vadd.f32 %v795_v23, %v226_v15  ;;  %v432_v26 = vpop.f32.mrb[7].mxu0  ;;  %v512_v27 = vpop.f32.mrb[7].mxu1  ;;  %v218_v14 = vld [vmem:[%s1159_s2 + $0x78] sm:$0xff] }
  0xf6   : > { %598 = vst.msk [vmem:[%s1004_s18 + $0x20] sm:$0xff] %vm593_vm2, %v565_v20  ;;  %614 = vst.msk [vmem:[%s1004_s18 + $0xa0] sm:$0xff] %vm593_vm2, %v581_v21  ;;  %v433_v28 = vadd.f32 %v432_v26, %v209_v18  ;;  %v513_v29 = vadd.f32 %v512_v27, %v225_v19  ;;  %v234_v15 = vld [vmem:[%s1159_s2 + $0xf8] sm:$0xff]  ;;  %v217_v18 = vld [vmem:[%s1159_s2 + $0x70] sm:$0xff] }
  0xf7   : > { %v568_v32 = vmax.f32 %v438_v24, 0.0  ;;  %v584_v33 = vmax.f32 %v518_v25, 0.0  ;;  %v233_v19 = vld [vmem:[%s1159_s2 + $0xf0] sm:$0xff] }
  0xf8   : > { %v567_v36 = vmax.f32 %v433_v28, 0.0  ;;  %v583_v37 = vmax.f32 %v513_v29, 0.0  ;;  %v774_v38 = vpop.f32.mrb[8].mxu0  ;;  %v798_v39 = vpop.f32.mrb[8].mxu1 }
  0xf9   : > { %601 = vst.msk [vmem:[%s1004_s18 + $0x38] sm:$0xff] %vm593_vm2, %v568_v32  ;;  %617 = vst.msk [vmem:[%s1004_s18 + $0xb8] sm:$0xff] %vm593_vm2, %v584_v33  ;;  %v448_v40 = vadd.f32 %v774_v38, %v212_v30  ;;  %v528_v41 = vadd.f32 %v798_v39, %v228_v31  ;;  %v442_v42 = vpop.f32.mrb[9].mxu0  ;;  %v522_v43 = vpop.f32.mrb[9].mxu1 }
  0xfa   : > { %600 = vst.msk [vmem:[%s1004_s18 + $0x30] sm:$0xff] %vm593_vm2, %v567_v36  ;;  %616 = vst.msk [vmem:[%s1004_s18 + $0xb0] sm:$0xff] %vm593_vm2, %v583_v37  ;;  %v443_v44 = vadd.f32 %v442_v42, %v211_v34  ;;  %v523_v45 = vadd.f32 %v522_v43, %v227_v35 }
  0xfb   : > { %v570_v48 = vmax.f32 %v448_v40, 0.0  ;;  %v586_v49 = vmax.f32 %v528_v41, 0.0 }
  0xfc   : > { %v569_v52 = vmax.f32 %v443_v44, 0.0  ;;  %v585_v53 = vmax.f32 %v523_v45, 0.0  ;;  %v777_v54 = vpop.f32.mrb[10].mxu0  ;;  %v801_v55 = vpop.f32.mrb[10].mxu1 }
  0xfd   : > { %603 = vst.msk [vmem:[%s1004_s18 + $0x48] sm:$0xff] %vm593_vm2, %v570_v48  ;;  %619 = vst.msk [vmem:[%s1004_s18 + $0xc8] sm:$0xff] %vm593_vm2, %v586_v49  ;;  %v458_v56 = vadd.f32 %v777_v54, %v214_v46  ;;  %v538_v57 = vadd.f32 %v801_v55, %v230_v47  ;;  %v452_v58 = vpop.f32.mrb[11].mxu0  ;;  %v532_v59 = vpop.f32.mrb[11].mxu1 }
  0xfe   : > { %602 = vst.msk [vmem:[%s1004_s18 + $0x40] sm:$0xff] %vm593_vm2, %v569_v52  ;;  %618 = vst.msk [vmem:[%s1004_s18 + $0xc0] sm:$0xff] %vm593_vm2, %v585_v53  ;;  %v453_v60 = vadd.f32 %v452_v58, %v213_v50  ;;  %v533_v61 = vadd.f32 %v532_v59, %v229_v51 }
  0xff   : > { %v572_v0 = vmax.f32 %v458_v56, 0.0  ;;  %v588_v1 = vmax.f32 %v538_v57, 0.0 }
 0x100   : > { %v571_v4 = vmax.f32 %v453_v60, 0.0  ;;  %v587_v5 = vmax.f32 %v533_v61, 0.0  ;;  %v780_v6 = vpop.f32.mrb[12].mxu0  ;;  %v804_v7 = vpop.f32.mrb[12].mxu1 }
 0x101   : > { %605 = vst.msk [vmem:[%s1004_s18 + $0x58] sm:$0xff] %vm593_vm2, %v572_v0  ;;  %621 = vst.msk [vmem:[%s1004_s18 + $0xd8] sm:$0xff] %vm593_vm2, %v588_v1  ;;  %v468_v8 = vadd.f32 %v780_v6, %v216_v62  ;;  %v548_v9 = vadd.f32 %v804_v7, %v232_v63  ;;  %v462_v10 = vpop.f32.mrb[13].mxu0  ;;  %v542_v11 = vpop.f32.mrb[13].mxu1 }
 0x102   : > { %604 = vst.msk [vmem:[%s1004_s18 + $0x50] sm:$0xff] %vm593_vm2, %v571_v4  ;;  %620 = vst.msk [vmem:[%s1004_s18 + $0xd0] sm:$0xff] %vm593_vm2, %v587_v5  ;;  %v463_v12 = vadd.f32 %v462_v10, %v215_v2  ;;  %v543_v13 = vadd.f32 %v542_v11, %v231_v3 }
 0x103   : > { %v574_v16 = vmax.f32 %v468_v8, 0.0  ;;  %v590_v17 = vmax.f32 %v548_v9, 0.0 }
 0x104   : > { %v573_v20 = vmax.f32 %v463_v12, 0.0  ;;  %v589_v21 = vmax.f32 %v543_v13, 0.0  ;;  %v783_v22 = vpop.f32.mrb[14].mxu0  ;;  %v807_v23 = vpop.f32.mrb[14].mxu1 }
 0x105   : > { %607 = vst.msk [vmem:[%s1004_s18 + $0x68] sm:$0xff] %vm593_vm2, %v574_v16  ;;  %623 = vst.msk [vmem:[%s1004_s18 + $0xe8] sm:$0xff] %vm593_vm2, %v590_v17  ;;  %v478_v24 = vadd.f32 %v783_v22, %v218_v14  ;;  %v558_v25 = vadd.f32 %v807_v23, %v234_v15  ;;  %v472_v26 = vpop.f32.mrb[15].mxu0  ;;  %v552_v27 = vpop.f32.mrb[15].mxu1 }
 0x106   : > { %606 = vst.msk [vmem:[%s1004_s18 + $0x60] sm:$0xff] %vm593_vm2, %v573_v20  ;;  %622 = vst.msk [vmem:[%s1004_s18 + $0xe0] sm:$0xff] %vm593_vm2, %v589_v21  ;;  %v473_v28 = vadd.f32 %v472_v26, %v217_v18  ;;  %v553_v29 = vadd.f32 %v552_v27, %v233_v19 }
 0x107   : > { %v576_v30 = vmax.f32 %v478_v24, 0.0  ;;  %v592_v31 = vmax.f32 %v558_v25, 0.0 }
 0x108   : > { %v575_v32 = vmax.f32 %v473_v28, 0.0  ;;  %v591_v33 = vmax.f32 %v553_v29, 0.0 }
 0x109   : > { %609 = vst.msk [vmem:[%s1004_s18 + $0x78] sm:$0xff] %vm593_vm2, %v576_v30  ;;  %625 = vst.msk [vmem:[%s1004_s18 + $0xf8] sm:$0xff] %vm593_vm2, %v592_v31 }
 0x10a   : > { %608 = vst.msk [vmem:[%s1004_s18 + $0x70] sm:$0xff] %vm593_vm2, %v575_v32  ;;  %624 = vst.msk [vmem:[%s1004_s18 + $0xf0] sm:$0xff] %vm593_vm2, %v591_v33 }
 0x10b PF: > { %s13_s12 = sadd.s32 1, %s824_s12  }
 0x10c   : > { %p10_p4 = scmp.ge.s32.totalorder %s13_s12, 4  }
 0x10e   :  { %12 = sbr.rel (!%p10_p4) target bundleno = 1 (0x1), region = 62 }

</bundles_post_ra>
